<compile_context>
chip_gen: v7x
topology: tpu7x:2x2x1
jax: 0.10.0
libtpu: 0.0.40
codegen_flags: <defaults>
</compile_context>

<pallas_src>
import functools
import math

import jax
import jax.numpy as jnp
from jax.experimental import pallas as pl
from jax.experimental.pallas import tpu as pltpu


# ----------------------------------------------------------------------------
# Tiling helpers (perf feedback: big, dtype-aware row tiles; VMEM headroom;
# keep >=2 grid steps so both v7x TensorCores get work).
# ----------------------------------------------------------------------------
_VMEM_LIMIT_BYTES = 48 * 1024 * 1024      # > default scoped limit, < v7x 64 MiB phys
_TILE_VMEM_BUDGET = 32 * 1024 * 1024      # double-buffered working-set target


def _round_up(x, m):
    return (x + m - 1) // m * m


def _choose_row_tile(rows, hidden, dtype, n_streams):
    """Largest row tile that keeps the double-buffered working set under budget.

    - multiple of the packed-sublane count (8 f32 / 16 bf16 / 32 int8-fp8)
    - capped so the grid has >= 2 steps when possible (v7x megacore)
    """
    elem = jnp.dtype(dtype).itemsize
    mult = max(8, 32 // max(elem, 1))
    per_row = hidden * (2 * n_streams * elem + 8)   # 2x-buffered streams + f32 temps
    tm = max(mult, min(_TILE_VMEM_BUDGET // max(per_row, 1), 1024))
    tm = (tm // mult) * mult
    if rows > mult:
        tm = min(tm, _round_up((rows + 1) // 2, mult))
    else:
        tm = mult
    return int(tm)


# ----------------------------------------------------------------------------
# RMSNorm kernel
# ----------------------------------------------------------------------------
def _rmsnorm_kernel(x_ref, w_ref, o_ref, *, eps):
    x = x_ref[...].astype(jnp.float32)
    # mean(x^2) over the hidden (lane) axis; 1/H folded into a constant multiply
    var = jnp.sum(x * x, axis=-1, keepdims=True) * (1.0 / x.shape[-1])
    inv = jax.lax.rsqrt(var + eps)
    # whole computation in f32, single cast at the end (perf feedback)
    o_ref[...] = (w_ref[...] * (x * inv)).astype(o_ref.dtype)


def rmsnorm(x, weight, eps=1e-6):
    orig_shape = x.shape
    H = orig_shape[-1]
    x2d = x.reshape(-1, H)
    rows = x2d.shape[0]

    tm = _choose_row_tile(rows, H, x.dtype, n_streams=2)
    rows_p = _round_up(rows, tm)
    if rows_p != rows:                          # tail handling via zero padding
        x2d = jnp.pad(x2d, ((0, rows_p - rows), (0, 0)))
    w2d = weight.astype(jnp.float32).reshape(1, H)   # weight pre-cast to f32

    out = pl.pallas_call(
        functools.partial(_rmsnorm_kernel, eps=eps),
        out_shape=jax.ShapeDtypeStruct((rows_p, H), x.dtype),
        grid_spec=pltpu.PrefetchScalarGridSpec(
            num_scalar_prefetch=0,
            grid=(rows_p // tm,),
            in_specs=[
                pl.BlockSpec((tm, H), lambda i: (i, 0)),   # activation tile
                pl.BlockSpec((1, H), lambda i: (0, 0)),    # resident weight
            ],
            out_specs=pl.BlockSpec((tm, H), lambda i: (i, 0)),
        ),
        compiler_params=pltpu.CompilerParams(
            dimension_semantics=("parallel",),
            vmem_limit_bytes=_VMEM_LIMIT_BYTES,
        ),
    )(x2d, w2d)
    out = out[:rows]
    return out.reshape(orig_shape)


# ----------------------------------------------------------------------------
# Tiled matmul kernel (all linear layers)
# ----------------------------------------------------------------------------
def _matmul_kernel(a_ref, b_ref, o_ref, acc_ref):
    @pl.when(pl.program_id(2) == 0)
    def _():
        acc_ref[...] = jnp.zeros_like(acc_ref)

    acc_ref[...] += jnp.dot(a_ref[...], b_ref[...],
                            preferred_element_type=jnp.float32)

    @pl.when(pl.program_id(2) == pl.num_programs(2) - 1)
    def _():
        o_ref[...] = acc_ref[...].astype(o_ref.dtype)


def matmul(a, b, out_dtype=None):
    M, K = a.shape
    _, N = b.shape
    out_dtype = out_dtype or a.dtype

    tm = min(256, _round_up(M, 8))
    tn = min(256, _round_up(N, 128))
    tk = min(512, _round_up(K, 128))
    Mp, Kp, Np = _round_up(M, tm), _round_up(K, tk), _round_up(N, tn)
    a_p = jnp.pad(a, ((0, Mp - M), (0, Kp - K))) if (Mp != M or Kp != K) else a
    b_p = jnp.pad(b, ((0, Kp - K), (0, Np - N))) if (Kp != K or Np != N) else b

    out = pl.pallas_call(
        _matmul_kernel,
        out_shape=jax.ShapeDtypeStruct((Mp, Np), out_dtype),
        grid_spec=pltpu.PrefetchScalarGridSpec(
            num_scalar_prefetch=0,
            grid=(Mp // tm, Np // tn, Kp // tk),
            in_specs=[
                pl.BlockSpec((tm, tk), lambda i, j, k: (i, k)),
                pl.BlockSpec((tk, tn), lambda i, j, k: (k, j)),
            ],
            out_specs=pl.BlockSpec((tm, tn), lambda i, j, k: (i, j)),
            scratch_shapes=[pltpu.VMEM((tm, tn), jnp.float32)],
        ),
        compiler_params=pltpu.CompilerParams(
            dimension_semantics=("parallel", "parallel", "arbitrary"),
            vmem_limit_bytes=_VMEM_LIMIT_BYTES,
        ),
    )(a_p, b_p)
    return out[:M, :N]


def linear(x, w):
    """PyTorch nn.Linear (no bias): x @ w.T with w of shape (out, in)."""
    orig = x.shape
    K = orig[-1]
    out = matmul(x.reshape(-1, K), w.T, out_dtype=x.dtype)
    return out.reshape(*orig[:-1], w.shape[0])


# ----------------------------------------------------------------------------
# Fused RoPE + attention kernel (one grid step per (batch, head))
# ----------------------------------------------------------------------------
def _attention_kernel(q_ref, k_ref, v_ref, cos_ref, sin_ref, mask_ref, o_ref, *, scale):
    q = q_ref[0, 0].astype(jnp.float32)
    k = k_ref[0, 0].astype(jnp.float32)
    v = v_ref[0, 0].astype(jnp.float32)
    cos = cos_ref[...].astype(jnp.float32)
    sin = sin_ref[...].astype(jnp.float32)

    S, D = q.shape
    half = D // 2
    lane = jax.lax.broadcasted_iota(jnp.int32, (S, D), 1)
    sign = jnp.where(lane < half, -1.0, 1.0)

    def rope(x):
        # rotate_half via XLU roll (free slot) + sign flip of the first half
        return x * cos + (pltpu.roll(x, shift=half, axis=1) * sign) * sin

    q = rope(q)
    k = rope(k)

    s = jnp.dot(q, k.T, preferred_element_type=jnp.float32) * scale
    s = s + mask_ref[0, 0].astype(jnp.float32)
    m = jnp.max(s, axis=-1, keepdims=True)
    p = jnp.exp(s - m)
    p = p / jnp.sum(p, axis=-1, keepdims=True)
    o = jnp.dot(p, v, preferred_element_type=jnp.float32)
    o_ref[0, 0] = o.astype(o_ref.dtype)


def attention(q, k, v, cos, sin, mask):
    # q, k, v: (B, nH, S, D); cos/sin: (S, D); mask: (B, 1, S, S)
    B, nh, S, D = q.shape
    scale = 1.0 / math.sqrt(D)
    return pl.pallas_call(
        functools.partial(_attention_kernel, scale=scale),
        out_shape=jax.ShapeDtypeStruct((B, nh, S, D), q.dtype),
        grid_spec=pltpu.PrefetchScalarGridSpec(
            num_scalar_prefetch=0,
            grid=(B, nh),
            in_specs=[
                pl.BlockSpec((1, 1, S, D), lambda b, h: (b, h, 0, 0)),
                pl.BlockSpec((1, 1, S, D), lambda b, h: (b, h, 0, 0)),
                pl.BlockSpec((1, 1, S, D), lambda b, h: (b, h, 0, 0)),
                pl.BlockSpec((S, D), lambda b, h: (0, 0)),
                pl.BlockSpec((S, D), lambda b, h: (0, 0)),
                pl.BlockSpec((1, 1, S, S), lambda b, h: (b, 0, 0, 0)),
            ],
            out_specs=pl.BlockSpec((1, 1, S, D), lambda b, h: (b, h, 0, 0)),
        ),
        compiler_params=pltpu.CompilerParams(
            dimension_semantics=("parallel", "parallel"),
        ),
    )(q, k, v, cos, sin, mask)


# ----------------------------------------------------------------------------
# Fused SwiGLU elementwise kernel: silu(gate) * up
# ----------------------------------------------------------------------------
def _swiglu_kernel(g_ref, u_ref, o_ref):
    g = g_ref[...].astype(jnp.float32)
    u = u_ref[...].astype(jnp.float32)
    o_ref[...] = (g * jax.nn.sigmoid(g) * u).astype(o_ref.dtype)


def swiglu(gate, up):
    orig = gate.shape
    H = orig[-1]
    g2 = gate.reshape(-1, H)
    u2 = up.reshape(-1, H)
    rows = g2.shape[0]
    tm = _choose_row_tile(rows, H, gate.dtype, n_streams=3)
    rows_p = _round_up(rows, tm)
    if rows_p != rows:
        g2 = jnp.pad(g2, ((0, rows_p - rows), (0, 0)))
        u2 = jnp.pad(u2, ((0, rows_p - rows), (0, 0)))
    out = pl.pallas_call(
        _swiglu_kernel,
        out_shape=jax.ShapeDtypeStruct((rows_p, H), gate.dtype),
        grid_spec=pltpu.PrefetchScalarGridSpec(
            num_scalar_prefetch=0,
            grid=(rows_p // tm,),
            in_specs=[
                pl.BlockSpec((tm, H), lambda i: (i, 0)),
                pl.BlockSpec((tm, H), lambda i: (i, 0)),
            ],
            out_specs=pl.BlockSpec((tm, H), lambda i: (i, 0)),
        ),
        compiler_params=pltpu.CompilerParams(
            dimension_semantics=("parallel",),
            vmem_limit_bytes=_VMEM_LIMIT_BYTES,
        ),
    )(g2, u2)
    return out[:rows].reshape(orig)


# ----------------------------------------------------------------------------
# Model wrapper (mirrors LlamaCasualModel.forward with labels=None)
# ----------------------------------------------------------------------------
class Config:
    vocab_size = 512
    hidden_size = 256
    intermediate_size = 512
    num_hidden_layers = 2
    num_attention_heads = 2          # head_dim = 128 (lane-friendly)
    max_position_embeddings = 64
    rms_norm_eps = 1e-6
    rope_theta = 10000.0
    initializer_range = 0.02


def _decoder_layer(h, lp, cos, sin, mask, cfg):
    B, S, H = h.shape
    nh = cfg.num_attention_heads
    hd = H // nh

    resid = h
    hn = rmsnorm(h, lp["input_ln"], eps=cfg.rms_norm_eps)

    def split(t):
        return t.reshape(B, S, nh, hd).transpose(0, 2, 1, 3)

    q = split(linear(hn, lp["q"]))
    k = split(linear(hn, lp["k"]))
    v = split(linear(hn, lp["v"]))
    attn = attention(q, k, v, cos, sin, mask)
    attn = attn.transpose(0, 2, 1, 3).reshape(B, S, H)
    h = linear(attn, lp["o"]) + resid

    resid = h
    hn = rmsnorm(h, lp["post_ln"], eps=cfg.rms_norm_eps)
    gate = linear(hn, lp["gate"])
    up = linear(hn, lp["up"])
    down = linear(swiglu(gate, up), lp["down"])
    return down + resid


def llama_forward(input_ids, params, cfg):
    # TODO(synk): token-embedding gather is data-dependent HBM indexing; left to
    # XLA (a Pallas version would need a scalar-prefetch DMA gather kernel).
    x = jnp.take(params["emb"], input_ids, axis=0)
    B, S, H = x.shape
    dtype = x.dtype
    hd = H // cfg.num_attention_heads

    min_val = jnp.finfo(dtype).min
    causal = jnp.triu(jnp.full((S, S), min_val, dtype=dtype), k=1)
    mask = jnp.broadcast_to(causal[None, None], (B, 1, S, S))

    inv_freq = 1.0 / (cfg.rope_theta ** (jnp.arange(0, hd, 2, dtype=jnp.float32) / hd))
    freqs = jnp.arange(S, dtype=jnp.float32)[:, None] * inv_freq[None, :]
    emb = jnp.concatenate([freqs, freqs], axis=-1)
    cos = jnp.cos(emb).astype(dtype)
    sin = jnp.sin(emb).astype(dtype)

    # NOTE: mirrors the reference forward, which feeds the SAME embeddings to
    # every decoder layer and keeps only the last layer's output.
    out = x
    for lp in params["layers"]:
        out = _decoder_layer(x, lp, cos, sin, mask, cfg)

    h = rmsnorm(out, params["final_norm"], eps=cfg.rms_norm_eps)
    last = h[:, -1:, :]                          # labels=None path: last token only
    logits = linear(last, params["lm_head"]).astype(jnp.float32)
    return logits


# ----------------------------------------------------------------------------
# Pure-jnp reference for correctness checking
# ----------------------------------------------------------------------------
def llama_forward_ref(input_ids, params, cfg):
    P = jax.lax.Precision.HIGHEST
    x = jnp.take(params["emb"], input_ids, axis=0)
    B, S, H = x.shape
    nh = cfg.num_attention_heads
    hd = H // nh
    dtype = x.dtype

    min_val = jnp.finfo(dtype).min
    mask = jnp.triu(jnp.full((S, S), min_val, dtype=dtype), k=1)[None, None]
    inv_freq = 1.0 / (cfg.rope_theta ** (jnp.arange(0, hd, 2, dtype=jnp.float32) / hd))
    freqs = jnp.arange(S, dtype=jnp.float32)[:, None] * inv_freq[None, :]
    emb = jnp.concatenate([freqs, freqs], axis=-1)
    cos = jnp.cos(emb).astype(dtype)
    sin = jnp.sin(emb).astype(dtype)

    def rms(h, w):
        hf = h.astype(jnp.float32)
        var = jnp.mean(hf * hf, axis=-1, keepdims=True)
        return w * (hf * jax.lax.rsqrt(var + cfg.rms_norm_eps)).astype(h.dtype)

    def rotate_half(t):
        t1, t2 = t[..., : hd // 2], t[..., hd // 2:]
        return jnp.concatenate([-t2, t1], axis=-1)

    def layer(h, lp):
        resid = h
        hn = rms(h, lp["input_ln"])

        def proj(w):
            y = jnp.einsum("bsh,oh->bso", hn, w, precision=P)
            return y.reshape(B, S, nh, hd).transpose(0, 2, 1, 3)

        q, k, v = proj(lp["q"]), proj(lp["k"]), proj(lp["v"])
        q = q * cos + rotate_half(q) * sin
        k = k * cos + rotate_half(k) * sin
        s = jnp.einsum("bnqd,bnkd->bnqk", q, k, precision=P) / math.sqrt(hd) + mask
        p = jax.nn.softmax(s.astype(jnp.float32), axis=-1).astype(dtype)
        o = jnp.einsum("bnqk,bnkd->bnqd", p, v, precision=P)
        o = o.transpose(0, 2, 1, 3).reshape(B, S, H)
        h = jnp.einsum("bsh,oh->bso", o, lp["o"], precision=P) + resid

        resid = h
        hn = rms(h, lp["post_ln"])
        g = jnp.einsum("bsh,ih->bsi", hn, lp["gate"], precision=P)
        u = jnp.einsum("bsh,ih->bsi", hn, lp["up"], precision=P)
        d = jnp.einsum("bsi,hi->bsh", jax.nn.silu(g) * u, lp["down"], precision=P)
        return d + resid

    out = x
    for lp in params["layers"]:
        out = layer(x, lp)                       # same quirk as the reference
    h = rms(out, params["final_norm"])
    logits = jnp.einsum("bsh,vh->bsv", h[:, -1:, :], params["lm_head"], precision=P)
    return logits.astype(jnp.float32)


# ----------------------------------------------------------------------------
# Deterministic parameter init (matches module: normal(0, 0.02), RMSNorm ones)
# ----------------------------------------------------------------------------
def init_params(key, cfg, dtype=jnp.float32):
    std = cfg.initializer_range
    H, I, V = cfg.hidden_size, cfg.intermediate_size, cfg.vocab_size
    n_layers = cfg.num_hidden_layers
    keys = iter(jax.random.split(key, 2 + 7 * n_layers))

    def dense(shape):
        return (std * jax.random.normal(next(keys), shape, dtype=jnp.float32)).astype(dtype)

    params = {
        "emb": dense((V, H)),
        "lm_head": dense((V, H)),
        "final_norm": jnp.ones((H,), dtype),
        "layers": [],
    }
    for _ in range(n_layers):
        params["layers"].append({
            "q": dense((H, H)), "k": dense((H, H)),
            "v": dense((H, H)), "o": dense((H, H)),
            "gate": dense((I, H)), "up": dense((I, H)), "down": dense((H, I)),
            "input_ln": jnp.ones((H,), dtype),
            "post_ln": jnp.ones((H,), dtype),
        })
    return params


if __name__ == "__main__":
    cfg = Config()
    key = jax.random.PRNGKey(0)
    k_param, k_ids, k_x = jax.random.split(key, 3)

    params = init_params(k_param, cfg)
    batch, seq = 2, 8
    input_ids = jax.random.randint(k_ids, (batch, seq), 0, cfg.vocab_size, dtype=jnp.int32)

    # Standalone RMSNorm kernel check (tight tolerance)
    xr = jax.random.normal(k_x, (4, 8, cfg.hidden_size), dtype=jnp.float32)
    wr = jnp.ones((cfg.hidden_size,), dtype=jnp.float32)
    rn = rmsnorm(xr, wr, eps=cfg.rms_norm_eps)
    var = jnp.mean(xr * xr, axis=-1, keepdims=True)
    rn_ref = wr * (xr * jax.lax.rsqrt(var + cfg.rms_norm_eps))
    assert rn.shape == xr.shape and rn.dtype == xr.dtype
    assert jnp.allclose(rn, rn_ref, atol=1e-5, rtol=1e-5)

    # Full model forward (Pallas) vs pure-jnp reference
    fwd = jax.jit(lambda ids, p: llama_forward(ids, p, cfg))
    logits = fwd(input_ids, params)
    jax.block_until_ready(logits)

    ref = llama_forward_ref(input_ids, params, cfg)
    assert logits.shape == (batch, 1, cfg.vocab_size)
    assert logits.dtype == jnp.float32
    assert jnp.allclose(logits, ref, atol=2e-2, rtol=2e-2)

    print("KERNEL_OK")
</pallas_src>

<mosaic_0001>
module attributes {stable_mosaic.version = 11 : i64} {
  func.func @_rmsnorm_kernel(%arg0: i32, %arg1: memref<16x256xf32, #tpu.memory_space<vmem>>, %arg2: memref<1x256xf32, #tpu.memory_space<vmem>>, %arg3: memref<16x256xf32, #tpu.memory_space<vmem>>) attributes {dimension_semantics = [#tpu.dimension_semantics<parallel>], iteration_bounds = array<i64: 2>, scalar_prefetch = 0 : i64, scratch_operands = 0 : i64, tpu.core_type = #tpu.core_type<tc>, window_params = [{transform_indices = @transform_0, window_bounds = array<i64: 16, 256>}, {pipeline_mode = #tpu.pipeline_mode<synchronous>, transform_indices = @transform_1, window_bounds = array<i64: 1, 256>}, {transform_indices = @transform_2, window_bounds = array<i64: 16, 256>}]} {
    %c0 = arith.constant 0 : index
    %c0_0 = arith.constant 0 : index
    %0 = vector.load %arg1[%c0, %c0_0] : memref<16x256xf32, #tpu.memory_space<vmem>>, vector<16x256xf32>
    %1 = arith.mulf %0, %0 : vector<16x256xf32>
    %cst = arith.constant dense<0.000000e+00> : vector<16xf32>
    %2 = vector.multi_reduction <add>, %1, %cst [1] : vector<16x256xf32> to vector<16xf32>
    %3 = vector.shape_cast %2 : vector<16xf32> to vector<16x1xf32>
    %cst_1 = arith.constant 3.906250e-03 : f32
    %4 = vector.broadcast %cst_1 : f32 to vector<16x1xf32>
    %5 = arith.mulf %3, %4 : vector<16x1xf32>
    %cst_2 = arith.constant 9.99999997E-7 : f32
    %6 = vector.broadcast %cst_2 : f32 to vector<16x1xf32>
    %7 = arith.addf %5, %6 : vector<16x1xf32>
    %8 = math.rsqrt %7 : vector<16x1xf32>
    %c0_3 = arith.constant 0 : index
    %c0_4 = arith.constant 0 : index
    %9 = vector.load %arg2[%c0_3, %c0_4] : memref<1x256xf32, #tpu.memory_space<vmem>>, vector<1x256xf32>
    %10 = vector.broadcast %8 : vector<16x1xf32> to vector<16x256xf32>
    %11 = arith.mulf %0, %10 : vector<16x256xf32>
    %12 = vector.broadcast %9 : vector<1x256xf32> to vector<16x256xf32>
    %13 = arith.mulf %12, %11 : vector<16x256xf32>
    %c0_5 = arith.constant 0 : index
    %c0_6 = arith.constant 0 : index
    %14 = vector.load %arg3[%c0_5, %c0_6] : memref<16x256xf32, #tpu.memory_space<vmem>>, vector<16x256xf32>
    tpu.vector_store %arg3[%c0_5, %c0_6], %13 {strides = array<i32>} : memref<16x256xf32, #tpu.memory_space<vmem>>, vector<16x256xf32>,
    return
  }
  func.func @transform_0(%arg0: i32) -> (i32, i32) {
    %c0_i32 = arith.constant 0 : i32
    %c0_i32_0 = arith.constant 0 : i32
    return %arg0, %c0_i32 : i32, i32
  }
  func.func @transform_1(%arg0: i32) -> (i32, i32) {
    %c0_i32 = arith.constant 0 : i32
    %c0_i32_0 = arith.constant 0 : i32
    %c0_i32_1 = arith.constant 0 : i32
    return %c0_i32, %c0_i32_0 : i32, i32
  }
  func.func @transform_2(%arg0: i32) -> (i32, i32) {
    %c0_i32 = arith.constant 0 : i32
    %c0_i32_0 = arith.constant 0 : i32
    return %arg0, %c0_i32 : i32, i32
  }
}

</mosaic_0001>

<bundles_post_ra>
// kernel: tpu_custom_call.1
= control target key start
LH: loop header
LB: loop body
LE: loop exit
PB: predicated region body
PF: predicated region fallthrough
CT: control target
= control target key end

     0   :  { %7 = vsyncpa [#allocation3], 0  ;;  %s659_s0 = inlined_call_operand.hbm [shape: f32[32,256], index: 0, kind: input, shape index: {}]   ;;  %s660_s1 = inlined_call_operand.vmem [shape: f32[1,256], index: 1, kind: input, shape index: {}]   ;;  %s661_s2 = inlined_call_operand.hbm [shape: f32[32,256], index: 2, kind: output, shape index: {}]  }
   0x1   :  { %9 = vsyncpa [#allocation3 + $0x1], 0 }
   0x2   :  { %10 = vsyncpa [#allocation4], 0 }
   0x3   :  { %12 = vsyncpa [#allocation4 + $0x1], 0  ;;  %s490_s9 = smov 0   ;;  %s492_s10 = smov 0  }
   0x4   :  { %s494_s11 = smov 0   ;;  %s496_s12 = smov 0  }
   0x5 LB: > { %s511_s13 = sadd.s32 4294967295, %s467_s12   ;;  %s297_s14 = sadd.s32 4294967294, %s467_s12   ;;  %s467_s12 = sphi %s496_s12, %s674_s12   ;;  %s463_s11 = sphi %s494_s11, %s673_s11   ;;  %s459_s10 = sphi %s492_s10, %s672_s10   ;;  %s455_s9 = sphi %s490_s9, %s671_s9  }
   0x6   : > { %s515_s15 = sadd.s32 1, %s467_s12   ;;  %s25_s16 = sadd.s32 1, %s463_s11 }
   0x7   : > { %s22_s17 = ssub.s32 %s467_s12, %s515_s15  ;;  %p32_p0 = scmp.ne.s32.totalorder %s463_s11, %s459_s10 }
   0x8   : > { %p23_p1 = scmp.eq.s32.totalorder %s22_s17, 0  ;;  %p33_p2 = scmp.eq.s32.totalorder %s467_s12, 0 }
   0x9   : > { %p38_p3 = scmp.ne.s32.totalorder %s459_s10, %s455_s9  ;;  %p39_p4 = scmp.eq.s32.totalorder %s511_s13, 0 }
   0xa   : > { %s527_s18 = scalar_select %p23_p1, %s463_s11, %s25_s16  }
   0xb   : > { %p529_p5 = por %p33_p2, %p32_p0  ;;  %p533_p6 = por %p39_p4, %p38_p3 }
   0xc   : > { %p83_p7 = scmp.eq.s32.totalorder %s511_s13, 1  ;;  %p89_p8 = scmp.eq.s32.totalorder %s297_s14, 1 }
   0xd   : > { %p329_p10 = scmp.lt.s32.totalorder %s467_s12, 2  ;;  %s112_s23 = sand.u32 1, %s463_s11  }
   0xe   : > { %p540_p11 = por %p83_p7, %p32_p0  ;;  %p544_p12 = por %p89_p8, %p38_p3 }
   0xf   : > { %s314_s24 = sshll.u32 %s467_s12, 9  ;;  %s300_s25 = sshll.u32 %s112_s23, 5 }
  0x10   : > { %s665_s21 = scalar_select %p540_p11, 1, 0 }
  0x11   : > { %s666_s22 = scalar_select %p544_p12, 1, 0 }
  0x12   : > { %s553_s28 = scalar_lea.hbm %s659_s0, %s314_s24  ;;  %s116_s29 = scalar_lea.vmem [#allocation2], %s300_s25 }
  0x13   : > { %s124_s30 = sshll.u32 %s116_s29, 4  ;;  %p557_p13 = pnand %p329_p10, %p529_p5  ;;  %s561_s30 = int_to_ptr.vmem [resolvable:$true] %s124_s30 }
  0x14   : > { %s563_s4 = scalar_lea.sflag [#allocation3], %s112_s23  ;;  %s371_s5 = scalar_lea.hbm %s553_s28, 512 }
  0x15   : > { %p372_p0 = scmp.ne.s32.totalorder %s553_s28, %s371_s5  ;;  %p373_p1 = pneg %p557_p13 }
  0x16   : > { %s376_s8 = scalar_lea.hbm %s659_s0, 1024  ;;  %p377_p4 = scmp.lt.u32.totalorder %s553_s28, %s659_s0 }
  0x17   : > { %p374_p2 = pnand %p373_p1, %p372_p0  ;;  %p378_p5 = scmp.lt.u32.totalorder %s376_s8, %s371_s5 }
  0x18   : > { %p380_p8 = scmp.lt.u32.totalorder %s371_s5, %s553_s28 }
  0x19   : > { %p375_p3 = pneg %p374_p2  ;;  %p379_p7 = por %p378_p5, %p377_p4 }
  0x1b   : > { %p381_p10 = por %p380_p8, %p379_p7 }
  0x1d   : > { %p382_p9 = pnand %p381_p10, %p375_p3 }
  0x1f   : > { %385 = shalt.err (!%p382_p9)
}
  0x20   : > { %s386_s17 = scalar_lea.vmem %s561_s30, 512  ;;  %s469_s19 = smov [#allocation2]  }
  0x21   : > { %p387_p0 = scmp.ne.s32.totalorder %s561_s30, %s386_s17  ;;  %s391_s23 = sshll.u32 %s469_s19, 4  ;;  %s392_s23 = int_to_ptr.vmem [resolvable:$false] %s391_s23 }
  0x22   : > { %s393_s24 = scalar_lea.vmem %s392_s23, 1024  ;;  %p394_p11 = scmp.lt.s32.totalorder %s561_s30, %s392_s23 }
  0x23   : > { %p389_p2 = pnand %p387_p0, %p373_p1  ;;  %p395_p4 = scmp.lt.s32.totalorder %s393_s24, %s386_s17 }
  0x25   : > { %p390_p12 = pneg %p389_p2  ;;  %p396_p5 = por %p395_p4, %p394_p11 }
  0x27   : > { %p397_p7 = pnand %p396_p5, %p390_p12 }
  0x29   : > { %400 = shalt.err (!%p397_p7)
}
  0x2a   : > { %s470_s25 = smov 256   ;;  %s471_s26 = smov 16  }
  0x2b   : > { %324 = dma.hbm_to_vmem [thread:$0]  (!%p557_p13), %s553_s28, 512, %s561_s30, %s563_s4, %s470_s25, %s470_s25, %s471_s26  }
  0x2c   : > { %p304_p9 = scmp.ge.s32.totalorder %s467_s12, 1  ;;  %p132_p1 = scmp.lt.s32.totalorder %s467_s12, 3 }
  0x2e   : > { %p133_p3 = pnand %p304_p9, %p132_p1 }
  0x2f   : > { %s594_s27 = sand.u32 (!%p133_p3), 1, %s459_s10  }
  0x30   : > { %136 = sbr.rel (%p133_p3) target bundleno = 241 (0xf1), region = 28  ;;  %s305_s29 = sshll.u32 (!%p133_p3), %s594_s27, 5 }
  0x31   : > { %s139_s5 = scalar_lea.sflag (!%p133_p3), [#allocation3], %s594_s27  ;;  %s142_s6 = scalar_lea.vmem (!%p133_p3), [#allocation2], %s305_s29 }
  0x37   : > { %446 = dma.done.wait (%p533_p6), %s139_s5, 512  }
  0x38   : > { %448 = vsyncadd (%p533_p6), %s139_s5, 4294966784  ;;  %v165_v0 = vld [vmem:[%s142_s6] sm:$0xff]  ;;  %v166_v1 = vld [vmem:[%s142_s6 + $0x8] sm:$0xff]  ;;  %v191_v12 = vlaneseq  ;;  %s316_s30 = sshll.u32 %s511_s13, 9  ;;  %s162_s3 = scalar_lea.vmem [#allocation5], %s305_s29 }
  0x39   : > { %v167_v2 = vld [vmem:[%s142_s6 + $0x10] sm:$0xff]  ;;  %v169_v3 = vmul.f32 %v165_v0, %v165_v0  ;;  %v170_v4 = vmul.f32 %v166_v1, %v166_v1  ;;  %v168_v5 = vld [vmem:[%s142_s6 + $0x18] sm:$0xff]  ;;  %v185_v20 = vld [vmem:[%s660_s1] sm:$0x3]  ;;  %s224_s4 = sshll.u32 %s162_s3, 4  ;;  %s613_s14 = scalar_lea.hbm %s661_s2, %s316_s30  ;;  %s615_s4 = int_to_ptr.vmem [resolvable:$true] %s224_s4 }
  0x3a   : > { %v171_v6 = vmul.f32 %v167_v2, %v167_v2  ;;  %v172_v7 = vmul.f32 %v168_v5, %v168_v5  ;;  %v192_v16 = vshrl.u32 %v191_v12, 7  ;;  %s210_s13 = scalar_lea.sflag [#allocation4], %s594_s27  ;;  %s401_s16 = scalar_lea.vmem %s615_s4, 512 }
  0x3b   : > { %v173_v8 = vadd.f32 %v170_v4, %v169_v3  ;;  %p402_p6 = scmp.ne.s32.totalorder %s615_s4, %s401_s16  ;;  %p668_p11 = scmp.ne.s32.totalorder %s665_s21, 0 }
  0x3c   : > { %v176_v9 = vadd.f32 %v172_v7, %v171_v6  ;;  %v193_v18 = vsub.s32 0, %v192_v16  ;;  %v197_v19 = vsub.s32 1, %v192_v16  ;;  %s472_s17 = smov [#allocation5]  }
  0x3d   : > { %174 = vadd.xlane.f32.xlu0 %v173_v8  ;;  %p403_p12 = pnand %p402_p6, %p668_p11  ;;  %s405_s19 = sshll.u32 %s472_s17, 4  ;;  %s406_s19 = int_to_ptr.vmem [resolvable:$false] %s405_s19 }
  0x3e   : > { %v194_v21 = vrot.slane %v185_v20, %v193_v18  ;;  %v198_v22 = vrot.slane %v185_v20, %v197_v19  ;;  %s407_s23 = scalar_lea.vmem %s406_s19, 1024  ;;  %p408_p8 = scmp.lt.s32.totalorder %s615_s4, %s406_s19 }
  0x3f   : > { %p404_p13 = pneg %p403_p12  ;;  %p409_p10 = scmp.lt.s32.totalorder %s407_s23, %s401_s16 }
  0x41   : > { %177 = vadd.xlane.f32.xlu0 %v176_v9  ;;  %p410_p0 = por %p409_p10, %p408_p8 }
  0x43   : > { %p411_p2 = pnand %p410_p0, %p404_p13 }
  0xca   : > { %v175_v10 = vpop.xlane.xlu0 %174 }
  0xcb   : > { %v179_v11 = vmul.f32 0.00390625, %v175_v10 }
  0xcd   : > { %v181_v13 = vadd.f32 1e-06, %v179_v11 }
  0xce   : > { %v178_v14 = vpop.xlane.xlu0 %177 }
  0xcf   : > { %367 = vrsqrt.f32 %v181_v13  ;;  %v180_v15 = vmul.f32 0.00390625, %v178_v14 }
  0xd1   : > { %v182_v17 = vadd.f32 1e-06, %v180_v15 }
  0xd3   : > { %369 = vrsqrt.f32 %v182_v17 }
  0xd9   : > { %v368_v23 = vpop.eup %367 }
  0xda   : > { %v186_v24 = vmul.f32 %v368_v23, %v165_v0  ;;  %v187_v25 = vmul.f32 %v368_v23, %v166_v1 }
  0xdc   : > { %v201_v26 = vmul.f32 %v194_v21, %v186_v24  ;;  %v202_v27 = vmul.f32 %v198_v22, %v187_v25 }
  0xdd   : > { %v370_v28 = vpop.eup %369 }
  0xde   : > { %205 = vst [vmem:[%s162_s3] sm:$0xff] %v201_v26  ;;  %206 = vst [vmem:[%s162_s3 + $0x8] sm:$0xff] %v202_v27  ;;  %v188_v29 = vmul.f32 %v370_v28, %v167_v2  ;;  %v189_v30 = vmul.f32 %v370_v28, %v168_v5 }
  0xe0   : > { %v203_v31 = vmul.f32 %v194_v21, %v188_v29  ;;  %v204_v32 = vmul.f32 %v198_v22, %v189_v30 }
  0xe2   : > { %207 = vst [vmem:[%s162_s3 + $0x10] sm:$0xff] %v203_v31  ;;  %208 = vst [vmem:[%s162_s3 + $0x18] sm:$0xff] %v204_v32 }
  0xe3   : > { %414 = shalt.err (!%p411_p2)
}
  0xe4   : > { %s415_s24 = scalar_lea.hbm %s613_s14, 512  ;;  %s419_s29 = scalar_lea.hbm %s661_s2, 1024 }
  0xe5   : > { %p416_p4 = scmp.ne.s32.totalorder %s613_s14, %s415_s24  ;;  %p420_p9 = scmp.lt.u32.totalorder %s613_s14, %s661_s2 }
  0xe6   : > { %p421_p1 = scmp.lt.u32.totalorder %s419_s29, %s415_s24  ;;  %p423_p6 = scmp.lt.u32.totalorder %s415_s24, %s613_s14 }
  0xe7   : > { %p417_p5 = pnand %p416_p4, %p668_p11 }
  0xe8   : > { %p422_p3 = por %p421_p1, %p420_p9 }
  0xe9   : > { %p418_p7 = pneg %p417_p5 }
  0xea   : > { %p424_p12 = por %p423_p6, %p422_p3 }
  0xec   : > { %p425_p13 = pnand %p424_p12, %p418_p7 }
  0xee   : > { %428 = shalt.err (!%p425_p13)
}
  0xef   : > { %s473_s20 = smov 256   ;;  %s474_s28 = smov 16  }
  0xf0   : > { %319 = dma.vmem_to_hbm [thread:$0]  (%p668_p11), %s615_s4, 512, %s613_s14, %s210_s13, %s473_s20, %s473_s20, %s474_s28  }
  0xf1 PF: > { %s239_s30 = sand.u32 1, %s455_s9   ;;  %p669_p8 = scmp.ne.s32.totalorder %s666_s22, 0 }
  0xf2   : > { %p670_p10 = scmp.ge.s32.totalorder %s467_s12, 2  ;;  %s240_s3 = scalar_lea.sflag [#allocation4], %s239_s30 }
  0xf4   : > { %p326_p0 = pnand %p670_p10, %p669_p8 }
  0xf6   : > { %450 = dma.done.wait (!%p326_p0), %s240_s3, 512  }
  0xf7   : > { %452 = vsyncadd (!%p326_p0), %s240_s3, 4294966784  ;;  %p15_p2 = scmp.ge.s32.totalorder %s515_s15, 4   ;;  %s671_s9 = smov %s459_s10 }
  0xf8   : > { %s672_s10 = smov %s463_s11  ;;  %s673_s11 = smov %s527_s18 }
  0xf9   : > { %s674_s12 = smov %s515_s15  ;;  %17 = sbr.rel (!%p15_p2) target bundleno = 5 (0x5), region = 73 }
 0x100   :  { %245 = vsyncpa [#allocation3], 1 }
 0x101   :  { %247 = vsyncpa [#allocation3 + $0x1], 1 }
 0x102   :  { %248 = vsyncpa [#allocation4], 1 }
 0x103   :  { %250 = vsyncpa [#allocation4 + $0x1], 1 }

</bundles_post_ra>
